<compile_context>
chip_gen: v7x
topology: tpu7x:2x2x1
jax: 0.10.0
libtpu: 0.0.40
codegen_flags: <defaults>
</compile_context>

<pallas_src>
import numpy as np
import jax
import jax.numpy as jnp
from jax.experimental import pallas as pl
from jax.experimental.pallas import tpu as pltpu

# ----------------------------- configuration --------------------------------
N_MODELS = 2            # number of spectral-domain sub-CNNs
N_CH     = 4            # n_channels per sub-model
F_OUT    = 6            # Conv1d out_channels per sub-model
K        = 3            # Conv1d kernel size (padding=1 -> 'same' length)
BATCH    = 2
PATCH    = 5            # spatial patch size (center pixel is extracted)

C_TOTAL   = N_MODELS * N_CH            # 8 input spectral channels
BIAS_COL  = C_TOTAL                    # ones-column carrying the bias row
C_PAD     = 16                         # padded contraction dim (2 sublane tiles)
OUT_VALID = N_MODELS * F_OUT * N_CH    # 48 valid output features
OUT_W     = 128                        # lane-dense output width (unmasked vst)


# ------------------------------ Pallas kernel --------------------------------
def _cnn_kernel(x_ref, w_ref, o_ref):
    # x_ref: (N_pad, C_PAD)   center-pixel spectra + ones column + zero pad
    # w_ref: (C_PAD, OUT_W)   banded conv weights, bias row at BIAS_COL
    # o_ref: (N_pad, OUT_W)   lanes [0, OUT_VALID) = flattened CnnWrapper output
    # One MXU contraction + ReLU; single unmasked full-width store.
    o_ref[...] = jnp.maximum(
        jnp.dot(x_ref[...], w_ref[...], preferred_element_type=jnp.float32),
        0.0,
    )


def _run_pallas(x_aug, w_aug):
    n = x_aug.shape[0]
    flops = 2 * n * C_PAD * OUT_W
    bytes_accessed = 4 * (n * C_PAD + C_PAD * OUT_W + n * OUT_W)
    # Gridless: a single step, all operands are whole-array VMEM blocks
    # (total footprint ~10 KiB — trivial on v5e/v6e/v7x).
    #
    # Scaling notes (not needed at batch=2):
    #   grid=(pl.cdiv(n, 512),)
    #   in_specs = [pl.BlockSpec((512, C_PAD), lambda i: (i, 0)),
    #               pl.BlockSpec((C_PAD, OUT_W), lambda i: (0, 0))]   # resident
    #   out_specs = pl.BlockSpec((512, OUT_W), lambda i: (i, 0))
    #   compiler_params=pltpu.CompilerParams(dimension_semantics=("parallel",))
    return pl.pallas_call(
        _cnn_kernel,
        out_shape=jax.ShapeDtypeStruct((n, OUT_W), jnp.float32),
        in_specs=[
            pl.BlockSpec(memory_space=pltpu.MemorySpace.VMEM),   # x (augmented)
            pl.BlockSpec(memory_space=pltpu.MemorySpace.VMEM),   # packed W (+bias row)
        ],
        out_specs=pl.BlockSpec(memory_space=pltpu.MemorySpace.VMEM),
        cost_estimate=pl.CostEstimate(
            flops=flops, transcendentals=0, bytes_accessed=bytes_accessed),
    )(x_aug, w_aug)


# --------------------------- parameter repacking ------------------------------
def _pack_params_np(conv_weights, conv_biases):
    """Host-side (numpy, once per parameter set) repack of per-model
    Conv1d(1, F, K, padding=1) weights + biases into one dense (C_PAD, OUT_W)
    table W such that

        relu([x, 1, 0...] @ W)[:, j],  j = (m*F_OUT + f)*N_CH + l

    reproduces conv 'same' + bias + ReLU + flatten + concat of CnnWrapper.
    No XLA scatter / gather appears in the forward trace.
    """
    w = np.asarray(conv_weights, dtype=np.float32)   # (M, F, K)
    b = np.asarray(conv_biases, dtype=np.float32)    # (M, F)
    W = np.zeros((C_PAD, OUT_W), np.float32)
    for m in range(N_MODELS):
        for f in range(F_OUT):
            for l in range(N_CH):
                j = (m * F_OUT + f) * N_CH + l       # final flattened-concat index
                for k in range(K):
                    src = l + k - 1                  # 'same' conv, pad=1
                    if 0 <= src < N_CH:              # zero pad at slice edges
                        W[m * N_CH + src, j] += w[m, f, k]
                W[BIAS_COL, j] = b[m, f]             # bias via ones column of x
    return jnp.asarray(W)


# ------------------------------ wrapper (glue) --------------------------------
def _forward(x, w_aug):
    # Center-pixel extraction mandated by the module.
    if x.ndim > 2:
        patch_size = x.shape[-1]
        x = x[:, 0, :, patch_size // 2, patch_size // 2]          # (N, C_TOTAL)
    x = x.astype(jnp.float32)
    n = x.shape[0]
    n_pad = ((n + 7) // 8) * 8                                    # sublane-align batch

    ones = jnp.ones((n, 1), jnp.float32)                          # bias channel
    x_aug = jnp.concatenate([x, ones], axis=1)                    # (n, C_TOTAL+1)
    x_aug = jnp.pad(x_aug, ((0, n_pad - n), (0, C_PAD - C_TOTAL - 1)))

    y = _run_pallas(x_aug, w_aug)                                 # (n_pad, 128)
    return y[:n, :OUT_VALID]                                      # flatten=True


def make_cnn_wrapper_forward(conv_weights, conv_biases):
    """Pack parameters once (host-side), return a jitted forward(x)."""
    # TODO(synk): conv_dropout=True branch (np.random at forward time) is
    # unsupported; this wrapper implements the module defaults
    # (flatten=True, conv_dropout=False).
    w_aug = _pack_params_np(conv_weights, conv_biases)
    return jax.jit(lambda x: _forward(x, w_aug))


# ------------------------------ reference ------------------------------------
def _reference(x, conv_weights, conv_biases):
    if x.ndim > 2:
        p = x.shape[-1]
        x = x[:, 0, :, p // 2, p // 2]
    x = x.astype(jnp.float32)
    outs, b = [], 0
    for m in range(N_MODELS):
        xm = x[:, b:b + N_CH]                                     # (N, L)
        xpad = jnp.pad(xm, ((0, 0), (K // 2, K // 2)))
        cols = jnp.stack([xpad[:, j:j + N_CH] for j in range(K)], axis=-1)  # (N,L,K)
        y = jnp.einsum("nlk,fk->nfl", cols, conv_weights[m]) \
            + conv_biases[m][None, :, None]
        y = jnp.maximum(y, 0.0)
        outs.append(y.reshape(y.shape[0], -1))
        b += N_CH
    return jnp.concatenate(outs, axis=-1)


# --------------------------------- main ---------------------------------------
if __name__ == "__main__":
    key = jax.random.PRNGKey(0)
    k_x, k_w, k_b = jax.random.split(key, 3)

    x = jax.random.normal(k_x, (BATCH, 1, N_MODELS * N_CH, PATCH, PATCH),
                          dtype=jnp.float32)
    conv_weights = 0.1 * jax.random.normal(k_w, (N_MODELS, F_OUT, K),
                                           dtype=jnp.float32)
    conv_biases = 0.1 * jax.random.normal(k_b, (N_MODELS, F_OUT),
                                          dtype=jnp.float32)

    forward = make_cnn_wrapper_forward(conv_weights, conv_biases)  # packs once
    out = jax.block_until_ready(forward(x))

    ref = _reference(x, conv_weights, conv_biases)
    assert out.shape == (BATCH, N_MODELS * F_OUT * N_CH), out.shape
    assert jnp.allclose(out, ref, atol=1e-5, rtol=1e-5), "mismatch vs reference"

    print("KERNEL_OK")
</pallas_src>

<mosaic_0001>
module attributes {stable_mosaic.version = 11 : i64} {
  func.func @_cnn_kernel(%arg0: memref<8x16xf32, #tpu.memory_space<vmem>>, %arg1: memref<16x128xf32, #tpu.memory_space<vmem>>, %arg2: memref<8x128xf32, #tpu.memory_space<vmem>>) attributes {dimension_semantics = [], scalar_prefetch = 0 : i64, scratch_operands = 0 : i64, tpu.core_type = #tpu.core_type<tc>} {
    %c0 = arith.constant 0 : index
    %c0_0 = arith.constant 0 : index
    %0 = vector.load %arg0[%c0, %c0_0] : memref<8x16xf32, #tpu.memory_space<vmem>>, vector<8x16xf32>
    %c0_1 = arith.constant 0 : index
    %c0_2 = arith.constant 0 : index
    %1 = vector.load %arg1[%c0_1, %c0_2] : memref<16x128xf32, #tpu.memory_space<vmem>>, vector<16x128xf32>
    %cst = arith.constant dense<0.000000e+00> : vector<8x128xf32>
    %2 = tpu.matmul %0, %1, %cst {dimension_numbers = #tpu.dot_dimension_numbers<[1], [0], [0], [1], [0, 0, 1, 1], [], []>} : vector<8x16xf32>, vector<16x128xf32>, vector<8x128xf32> -> vector<8x128xf32>
    %cst_3 = arith.constant 0.000000e+00 : f32
    %3 = vector.broadcast %cst_3 : f32 to vector<8x128xf32>
    %4 = arith.maximumf %2, %3 : vector<8x128xf32>
    %c0_4 = arith.constant 0 : index
    %c0_5 = arith.constant 0 : index
    %5 = vector.load %arg2[%c0_4, %c0_5] : memref<8x128xf32, #tpu.memory_space<vmem>>, vector<8x128xf32>
    tpu.vector_store %arg2[%c0_4, %c0_5], %4 {strides = array<i32>} : memref<8x128xf32, #tpu.memory_space<vmem>>, vector<8x128xf32>,
    return
  }
}

</mosaic_0001>

<bundles_post_ra>
// kernel: _lambda_.1
= control target key start
LH: loop header
LB: loop body
LE: loop exit
PB: predicated region body
PF: predicated region fallthrough
CT: control target
= control target key end

     0   :  { %v111_v0 = vmov 0.0|0.0   ;;  %vm112_vm0 = vmmov 0   ;;  %v113_v3 = vmov 0.0   ;;  %vm14_vm1 = vcmask 130048   ;;  %s141_s1 = inlined_call_operand.vmem [shape: f32[16,128], index: 1, kind: input, shape index: {}]   ;;  %s142_s0 = inlined_call_operand.vmem [shape: f32[8,16], index: 0, kind: input, shape index: {}]   ;;  %s143_s2 = inlined_call_operand.vmem [shape: f32[8,128], index: 2, kind: output, shape index: {}]  }
   0x1   :  { %105 = vmatprep.subr.bf16.mxu0 %v111_v0  ;;  %v12_v1 = vld [vmem:[%s141_s1] sm:$0xff]  ;;  %v13_v2 = vld [vmem:[%s141_s1 + $0x8] sm:$0xff]  ;;  %102 = vmatprep.mubr.msk.f32.mxu0 %vm112_vm0, %v113_v3 }
   0x2   :  { %v106_v4 = vpack.c.bf16 %v13_v2, %v12_v1  ;;  %v11_v5 = vld [vmem:[%s142_s0] sm:$0xff] }
   0x4   :  { %107 = vmatpush3.bf16.msra.mxu0 %v106_v4 }
   0x7   :  { %103 = vmatmul.mubr.msk.f32.vlgmr.msra.gmra.mrb[0].mxu0 %vm14_vm1, %v11_v5 }
  0xda   :  { %v84_v6 = vpop.f32.mrb[0].mxu0 }
  0xdb   :  { %v88_v7 = vmax.f32 %v84_v6, 0.0  ;;  %v104_v8 = vpop.f32.mrb[1].mxu0 }
  0xdd   :  { %89 = vst [vmem:[%s143_s2] sm:$0xff] %v88_v7 }

</bundles_post_ra>
